<compile_context>
chip_gen: v7x
topology: tpu7x:2x2x1
jax: 0.10.0
libtpu: 0.0.40
codegen_flags: <defaults>
</compile_context>

<pallas_src>
import functools

import jax
import jax.numpy as jnp
from jax.experimental import pallas as pl
from jax.experimental.pallas import tpu as pltpu


def _add_kernel(x_ref, y_ref, o_ref):
    # Hot path: one VPU element-wise add over a wide, lane-dense VMEM tile.
    o_ref[...] = x_ref[...] + y_ref[...]


# Widest lane dimension first: lane-dense output -> wide unmasked vector
# stores and fewer grid steps.
_LANE_CANDIDATES = (8192, 4096, 2048, 1024, 512, 256, 128)

# Per-generation (target block bytes per operand, vmem_limit_bytes).
# 3 operands x 2 pipeline buffers x block_bytes must stay under the limit.
#   v7x : 64 MiB physical VMEM per TC, 2 TCs  -> 6 MiB blocks, 48 MiB limit
#   v6e : 128 MiB physical VMEM               -> 8 MiB blocks, 64 MiB limit
#   v5e : 128 MiB physical VMEM               -> 8 MiB blocks, 64 MiB limit
#   ?   : conservative defaults safe everywhere
_GEN_PARAMS = {
    "v7x": (6 * 1024 * 1024, 48 * 1024 * 1024),
    "v6e": (8 * 1024 * 1024, 64 * 1024 * 1024),
    "v5e": (8 * 1024 * 1024, 64 * 1024 * 1024),
    "unknown": (4 * 1024 * 1024, 32 * 1024 * 1024),
}

# Below this, launch/pipeline-setup overhead dominates, and — more importantly —
# a standalone pallas_call forces x, y and out to be materialized in HBM
# (3 full passes), whereas XLA can usually fuse a small add into its
# producer/consumer for zero extra HBM traffic.  Prefer the jnp path there.
_MIN_PALLAS_ELEMENTS = 1 << 16


@functools.lru_cache(maxsize=1)
def _tpu_generation():
    """Best-effort TPU generation detection; never raises."""
    try:
        kind = jax.devices()[0].device_kind.lower()
    except Exception:  # pragma: no cover - defensive
        return "unknown"
    if "v7" in kind:
        return "v7x"
    if "v6" in kind:
        return "v6e"
    if "v5" in kind:
        return "v5e"
    return "unknown"


def _pick_block_rows(rows, sublane, ideal_rows):
    """Choose block_rows (a multiple of `sublane`, or == rows).

    Priorities (from the perf review):
      1. at least 2 grid steps whenever the sublane axis can be split
         (v7x has 2 TensorCores; a single-step grid leaves one idle),
      2. among short grids, prefer an even step count (avoid 2:1 imbalance),
      3. prefer a block that evenly divides rows (no masked ragged tail),
      4. otherwise the largest block <= ideal_rows (amortize per-step overhead).
    """
    if rows < 2 * sublane:
        # Can't split on sublane granularity; a full-extent block is legal.
        return rows

    # Largest block that still yields >= 2 grid steps.
    cap = max(((rows // 2) // sublane) * sublane, sublane)
    best = min(max((ideal_rows // sublane) * sublane, sublane), cap)

    def score(br):
        steps = -(-rows // br)  # ceil-div
        divides = (rows % br == 0)
        balanced = (steps % 2 == 0) or steps > 8
        return (divides and balanced, divides, balanced, br)

    candidates = []
    br = best
    for _ in range(32):  # bounded walk down in sublane-sized notches
        if br < sublane:
            break
        candidates.append(br)
        br -= sublane
    return max(candidates, key=score)


def customized_add(x, y, *, force_pallas=False):
    """Pallas implementation of `customized_add(x, y) = x + y`."""
    assert x.shape == y.shape, "customized_add requires matching shapes"
    assert x.dtype == y.dtype, "customized_add requires matching dtypes"

    n = x.size
    # Fallbacks:
    #  * tiny inputs: launch overhead dominates and XLA fusion avoids the
    #    3 extra HBM passes a standalone pallas_call implies.
    #  * sizes not a multiple of 128: a pad+slice path would add a full extra
    #    HBM pass per operand for a bandwidth-bound op, so just use jnp.
    # TODO(synk): handle the ragged (<128-multiple) tail with a masked store
    # instead of falling back, if such shapes ever matter for perf.
    if n == 0 or (n % 128 != 0) or (n < _MIN_PALLAS_ELEMENTS and not force_pallas):
        return x + y

    orig_shape = x.shape
    # Contiguous reshape (no HBM copy for default row-major layouts).
    x_flat = x.reshape(-1)
    y_flat = y.reshape(-1)

    # Widest lane width that evenly divides n -> no padding, no trailing slice.
    cols = next(c for c in _LANE_CANDIDATES if n % c == 0)
    rows = n // cols

    itemsize = jnp.dtype(x.dtype).itemsize
    # Sublane multiple is dtype-aware: f32 -> 8, bf16/f16 -> 16, int8/fp8 -> 32.
    sublane = max(8, 32 // max(itemsize, 1))

    target_block_bytes, vmem_limit_bytes = _GEN_PARAMS[_tpu_generation()]
    ideal_rows = max(target_block_bytes // (cols * itemsize), 1)
    block_rows = _pick_block_rows(rows, sublane, ideal_rows)

    grid = (pl.cdiv(rows, block_rows),)

    x2 = x_flat.reshape(rows, cols)
    y2 = y_flat.reshape(rows, cols)

    # TODO(synk): sweep pipeline_mode=pl.Buffered(3) on the input specs once
    # measured with xprof; expected <5% and only if VMEM headroom remains.
    out = pl.pallas_call(
        _add_kernel,
        out_shape=jax.ShapeDtypeStruct((rows, cols), x.dtype),
        grid_spec=pltpu.PrefetchScalarGridSpec(
            num_scalar_prefetch=0,
            grid=grid,
            in_specs=[
                pl.BlockSpec((block_rows, cols), lambda i: (i, 0)),
                pl.BlockSpec((block_rows, cols), lambda i: (i, 0)),
            ],
            out_specs=pl.BlockSpec((block_rows, cols), lambda i: (i, 0)),
        ),
        compiler_params=pltpu.CompilerParams(
            # Grid axis is fully independent -> shards across the 2 TCs on v7x.
            dimension_semantics=("parallel",),
            # Per-generation limit: 3 operands x 2 buffers x block fits with
            # headroom (v7x 36/48 MiB, v5e/v6e 48/64 MiB, unknown 24/32 MiB).
            vmem_limit_bytes=vmem_limit_bytes,
        ),
    )(x2, y2)

    return out.reshape(orig_shape)


if __name__ == "__main__":
    key = jax.random.PRNGKey(0)

    # 1) Small shape consistent with the module (2, 4, 16, 16); force the
    #    Pallas path so the kernel actually runs at this size.
    k1, k2, key = (*jax.random.split(key, 2), key)
    shape_small = (2, 4, 16, 16)
    xs = jax.random.normal(k1, shape_small, dtype=jnp.float32)
    ys = jax.random.normal(k2, shape_small, dtype=jnp.float32)
    out_small = jax.block_until_ready(customized_add(xs, ys, force_pallas=True))
    assert out_small.shape == shape_small and out_small.dtype == xs.dtype
    assert jnp.allclose(out_small, xs + ys, atol=1e-6, rtol=1e-6)

    # 2) Larger f32 case exercising wide (8192-lane) blocks and a multi-step
    #    grid that splits evenly across both v7x TensorCores (2 even steps).
    k3, k4, key = (*jax.random.split(key, 2), key)
    shape_big = (512, 2048)
    xb = jax.random.normal(k3, shape_big, dtype=jnp.float32)
    yb = jax.random.normal(k4, shape_big, dtype=jnp.float32)
    out_big = jax.block_until_ready(customized_add(xb, yb))
    assert jnp.allclose(out_big, xb + yb, atol=1e-6, rtol=1e-6)

    # 3) bf16 case exercising the dtype-aware (16-row) sublane tiling.
    k5, k6, key = (*jax.random.split(key, 2), key)
    shape_bf = (256, 2048)
    xh = jax.random.normal(k5, shape_bf, dtype=jnp.float32).astype(jnp.bfloat16)
    yh = jax.random.normal(k6, shape_bf, dtype=jnp.float32).astype(jnp.bfloat16)
    out_bf = jax.block_until_ready(customized_add(xh, yh))
    assert jnp.array_equal(out_bf, xh + yh)

    # 4) Non-divisible row count -> ragged (masked) final block path.
    #    (808 * 256 = 206848 elements, cols=2048 -> rows=101, block_rows < rows)
    k7, k8, key = (*jax.random.split(key, 2), key)
    shape_ragged = (808, 256)
    xg = jax.random.normal(k7, shape_ragged, dtype=jnp.float32)
    yg = jax.random.normal(k8, shape_ragged, dtype=jnp.float32)
    out_rg = jax.block_until_ready(customized_add(xg, yg))
    assert jnp.allclose(out_rg, xg + yg, atol=1e-6, rtol=1e-6)

    # 5) Ragged / tiny fallback path (plain jnp add).
    k9, k10, _ = (*jax.random.split(key, 2), key)
    xr = jax.random.normal(k9, (3, 5), dtype=jnp.float32)
    yr = jax.random.normal(k10, (3, 5), dtype=jnp.float32)
    out_r = jax.block_until_ready(customized_add(xr, yr))
    assert jnp.allclose(out_r, xr + yr, atol=1e-6, rtol=1e-6)

    print("KERNEL_OK")
</pallas_src>

<mosaic_0001>
module attributes {stable_mosaic.version = 11 : i64} {
  func.func @_add_kernel(%arg0: i32, %arg1: memref<1x2048xf32, #tpu.memory_space<vmem>>, %arg2: memref<1x2048xf32, #tpu.memory_space<vmem>>, %arg3: memref<1x2048xf32, #tpu.memory_space<vmem>>) attributes {dimension_semantics = [#tpu.dimension_semantics<parallel>], iteration_bounds = array<i64: 1>, scalar_prefetch = 0 : i64, scratch_operands = 0 : i64, tpu.core_type = #tpu.core_type<tc>, window_params = [{transform_indices = @transform_0, window_bounds = array<i64: 1, 2048>}, {transform_indices = @transform_1, window_bounds = array<i64: 1, 2048>}, {transform_indices = @transform_2, window_bounds = array<i64: 1, 2048>}]} {
    %c0 = arith.constant 0 : index
    %c0_0 = arith.constant 0 : index
    %0 = vector.load %arg1[%c0, %c0_0] : memref<1x2048xf32, #tpu.memory_space<vmem>>, vector<1x2048xf32>
    %c0_1 = arith.constant 0 : index
    %c0_2 = arith.constant 0 : index
    %1 = vector.load %arg2[%c0_1, %c0_2] : memref<1x2048xf32, #tpu.memory_space<vmem>>, vector<1x2048xf32>
    %2 = arith.addf %0, %1 : vector<1x2048xf32>
    %c0_3 = arith.constant 0 : index
    %c0_4 = arith.constant 0 : index
    %3 = vector.load %arg3[%c0_3, %c0_4] : memref<1x2048xf32, #tpu.memory_space<vmem>>, vector<1x2048xf32>
    tpu.vector_store %arg3[%c0_3, %c0_4], %2 {strides = array<i32>} : memref<1x2048xf32, #tpu.memory_space<vmem>>, vector<1x2048xf32>,
    return
  }
  func.func @transform_0(%arg0: i32) -> (i32, i32) {
    %c0_i32 = arith.constant 0 : i32
    %c0_i32_0 = arith.constant 0 : i32
    return %arg0, %c0_i32 : i32, i32
  }
  func.func @transform_1(%arg0: i32) -> (i32, i32) {
    %c0_i32 = arith.constant 0 : i32
    %c0_i32_0 = arith.constant 0 : i32
    return %arg0, %c0_i32 : i32, i32
  }
  func.func @transform_2(%arg0: i32) -> (i32, i32) {
    %c0_i32 = arith.constant 0 : i32
    %c0_i32_0 = arith.constant 0 : i32
    return %arg0, %c0_i32 : i32, i32
  }
}

</mosaic_0001>

<bundles_post_ra>
// kernel: tpu_custom_call.1
= control target key start
LH: loop header
LB: loop body
LE: loop exit
PB: predicated region body
PF: predicated region fallthrough
CT: control target
= control target key end

     0   :  { %7 = vsyncpa [#allocation3], 0  ;;  %s189_s0 = inlined_call_operand.hbm [shape: f32[1,2048], index: 0, kind: input, shape index: {}]   ;;  %s190_s1 = inlined_call_operand.hbm [shape: f32[1,2048], index: 1, kind: input, shape index: {}]   ;;  %s191_s2 = inlined_call_operand.hbm [shape: f32[1,2048], index: 2, kind: output, shape index: {}]  }
   0x1   :  { %8 = vsyncpa [#allocation6], 0 }
   0x2   :  { %9 = vsyncpa [#allocation4], 0  ;;  %s135_s9 = smov [#allocation2]   ;;  %s136_s11 = smov [#allocation5]  }
   0x3   :  { %s16_s10 = sshll.u32 %s135_s9, 4  ;;  %s26_s12 = sshll.u32 %s136_s11, 4  ;;  %s17_s10 = int_to_ptr.vmem [resolvable:$true] %s16_s10  ;;  %s27_s12 = int_to_ptr.vmem [resolvable:$true] %s26_s12 }
   0x4   :  { %s63_s15 = scalar_lea.hbm %s189_s0, 256 }
   0x5   :  { %p64_p0 = scmp.ne.s32.totalorder %s189_s0, %s63_s15  ;;  %p67_p1 = scmp.lt.u32.totalorder %s63_s15, %s189_s0 }
   0x7   :  { %p69_p2 = pnand %p67_p1, %p64_p0 }
   0x9   :  { %72 = shalt.err (!%p69_p2)
}
   0xa   :  { %s73_s20 = scalar_lea.vmem %s17_s10, 256  ;;  %p78_p4 = scmp.lt.s32.totalorder %s17_s10, %s17_s10 }
   0xb   :  { %p74_p3 = scmp.ne.s32.totalorder %s17_s10, %s73_s20  ;;  %p79_p5 = scmp.lt.s32.totalorder %s73_s20, %s73_s20 }
   0xd   :  { %p80_p6 = por %p79_p5, %p78_p4 }
   0xf   :  { %p81_p7 = pnand %p80_p6, %p74_p3 }
  0x11   :  { %84 = shalt.err (!%p81_p7)
}
  0x12   :  { %19 = dma.hbm_to_vmem [thread:$0]  %s189_s0, 256, %s17_s10, [#allocation3]  }
  0x13   :  { %s85_s25 = scalar_lea.hbm %s190_s1, 256 }
  0x14   :  { %p86_p8 = scmp.ne.s32.totalorder %s190_s1, %s85_s25  ;;  %p89_p9 = scmp.lt.u32.totalorder %s85_s25, %s190_s1 }
  0x16   :  { %p91_p10 = pnand %p89_p9, %p86_p8 }
  0x18   :  { %94 = shalt.err (!%p91_p10)
}
  0x19   :  { %s95_s30 = scalar_lea.vmem %s27_s12, 256  ;;  %p100_p12 = scmp.lt.s32.totalorder %s27_s12, %s27_s12 }
  0x1a   :  { %p96_p11 = scmp.ne.s32.totalorder %s27_s12, %s95_s30  ;;  %p101_p13 = scmp.lt.s32.totalorder %s95_s30, %s95_s30 }
  0x1c   :  { %p102_p0 = por %p101_p13, %p100_p12 }
  0x1e   :  { %p103_p1 = pnand %p102_p0, %p96_p11 }
  0x20   :  { %106 = shalt.err (!%p103_p1)
}
  0x21   :  { %29 = dma.hbm_to_vmem [thread:$0]  %s190_s1, 256, %s27_s12, [#allocation6]  }
  0x22   :  { %129 = dma.done.wait [#allocation3], 256  }
  0x23   :  { %130 = vsyncadd [#allocation3], 4294967040 }
  0x24   :  { %131 = dma.done.wait [#allocation6], 256  }
  0x25   :  { %132 = vsyncadd [#allocation6], 4294967040  ;;  %s137_s4 = smov [#allocation7]   ;;  %v36_v0 = vld [vmem:[#allocation2] sm:$0xff]  ;;  %v38_v1 = vld [vmem:[#allocation5] sm:$0xff] }
  0x26   :  { %s50_s5 = sshll.u32 %s137_s4, 4  ;;  %v37_v2 = vld [vmem:[#allocation2 + $0x8] sm:$0xff]  ;;  %v40_v3 = vadd.f32 %v38_v1, %v36_v0  ;;  %v39_v4 = vld [vmem:[#allocation5 + $0x8] sm:$0xff]  ;;  %s51_s5 = int_to_ptr.vmem [resolvable:$true] %s50_s5 }
  0x27   :  { %v41_v5 = vadd.f32 %v39_v4, %v37_v2  ;;  %s107_s6 = scalar_lea.vmem %s51_s5, 256  ;;  %p112_p3 = scmp.lt.s32.totalorder %s51_s5, %s51_s5 }
  0x28   :  { %42 = vst [vmem:[#allocation7] sm:$0xff] %v40_v3  ;;  %p108_p2 = scmp.ne.s32.totalorder %s51_s5, %s107_s6  ;;  %p113_p4 = scmp.lt.s32.totalorder %s107_s6, %s107_s6 }
  0x29   :  { %43 = vst [vmem:[#allocation7 + $0x8] sm:$0xff] %v41_v5 }
  0x2a   :  { %p114_p5 = por %p113_p4, %p112_p3 }
  0x2c   :  { %p115_p6 = pnand %p114_p5, %p108_p2 }
  0x2e   :  { %118 = shalt.err (!%p115_p6)
}
  0x2f   :  { %s119_s8 = scalar_lea.hbm %s191_s2, 256 }
  0x30   :  { %p120_p7 = scmp.ne.s32.totalorder %s191_s2, %s119_s8  ;;  %p123_p8 = scmp.lt.u32.totalorder %s119_s8, %s191_s2 }
  0x32   :  { %p125_p9 = pnand %p123_p8, %p120_p7 }
  0x34   :  { %128 = shalt.err (!%p125_p9)
}
  0x35   :  { %53 = dma.vmem_to_hbm [thread:$0]  %s51_s5, 256, %s191_s2, [#allocation4]  }
  0x36   :  { %133 = dma.done.wait [#allocation4], 256  }
  0x37   :  { %134 = vsyncadd [#allocation4], 4294967040 }
  0x38   :  { %57 = vsyncpa [#allocation3], 1 }
  0x39   :  { %58 = vsyncpa [#allocation6], 1 }
  0x3a   :  { %59 = vsyncpa [#allocation4], 1 }

</bundles_post_ra>
